<compile_context>
chip_gen: v5e
topology: v5e:2x2
jax: 0.10.0
libtpu: 0.0.40
codegen_flags: <defaults>
</compile_context>

<pallas_src>
import functools

import jax
import jax.numpy as jnp
from jax.experimental import pallas as pl
from jax.experimental.pallas import tpu as pltpu

EPS = 1e-6


# ------------------------------ Pallas kernels ------------------------------ #

def _layernorm_kernel(x_ref, a_ref, b_ref, o_ref, *, eps):
    """a_2 * (x - mean) / (std_unbiased + eps) + b_2 for one (tm, D) tile."""
    x = x_ref[...].astype(jnp.float32)                       # (tm, D)
    n = x.shape[-1]
    mean = jnp.mean(x, axis=-1, keepdims=True)
    centered = x - mean
    # torch.Tensor.std defaults to the unbiased estimator (divide by n-1).
    var = jnp.sum(centered * centered, axis=-1, keepdims=True) * (1.0 / (n - 1))
    # eps is added to std (not variance) to match the custom PyTorch LayerNorm.
    # approx=True (EUP) would introduce ~1e-3 rel error on the normalizer;
    # keep the exact form (negligible cost: kernel is HBM-bound).
    inv = pl.reciprocal(jnp.sqrt(var) + eps, approx=False)
    y = a_ref[...] * (centered * inv) + b_ref[...]            # (1,D) bcast in-reg
    o_ref[...] = y.astype(o_ref.dtype)


def _layernorm_packed_kernel(x_ref, a_ref, b_ref, o_ref, *, eps, d, k):
    """Lane-dense variant: k logical rows of width d packed per (k*d)-lane row.

    x_ref is (tm, k*d) with k*d == 128, so vregs / DMAs / stores are fully
    lane-dense.  Each of the k segments is an independent LayerNorm row.
    """
    x = x_ref[...].astype(jnp.float32)                        # (tm, k*d)
    gamma = a_ref[...]                                        # (1, d) f32
    beta = b_ref[...]                                         # (1, d) f32
    parts = []
    for j in range(k):                                        # static unroll, k <= 8
        xj = x[:, j * d:(j + 1) * d]                          # (tm, d)
        mean = jnp.mean(xj, axis=-1, keepdims=True)
        c = xj - mean
        var = jnp.sum(c * c, axis=-1, keepdims=True) * (1.0 / (d - 1))
        inv = pl.reciprocal(jnp.sqrt(var) + eps, approx=False)
        parts.append(gamma * (c * inv) + beta)
    o_ref[...] = jnp.concatenate(parts, axis=-1).astype(o_ref.dtype)


# ------------------------------ tiling helpers ------------------------------ #

def _round_up(x, m):
    return (x + m - 1) // m * m


def _sublane_align(itemsize):
    # f32 -> 8, bf16/f16 -> 16, int8/fp8 -> 32 (dtype sublane packing).
    return max(8, 32 // max(1, itemsize))


def _vmem_limit_bytes():
    """Generation-aware scoped-VMEM request (64 MiB on 128 MiB chips, ~48 MiB on v7x)."""
    cap = 128 * 1024 * 1024
    try:
        info_fn = getattr(pltpu, "get_tpu_info", None)
        if info_fn is not None:
            cap = int(getattr(info_fn(), "vmem_capacity_bytes", cap))
    except Exception:
        pass
    return int(min(64 * 1024 * 1024, max(32 * 1024 * 1024, cap - 16 * 1024 * 1024)))


def _pick_block_rows(M, D, itemsize, vmem_limit):
    """Largest legal row tile that (a) keeps the double-buffered working set
    comfortably under half the VMEM limit, (b) stays below an ~8 MiB f32 input
    slab (past the measured HBM-roofline knee), and (c) leaves >= ~8 grid
    steps for megacore sharding (v7x) and pipelining."""
    align = _sublane_align(itemsize)
    if M <= align:
        return M                                   # full-extent block: always legal
    # Per-row VMEM: 2x double-buffered input + output (native dtype) plus ~3
    # f32-sized temporaries (x, centered, y) during compute.
    bytes_per_row = D * (4 * itemsize + 3 * 4)
    rows = (vmem_limit // 2) // max(1, bytes_per_row)
    rows = min(rows, (8 * 1024 * 1024) // max(1, D * 4))
    rows = min(rows, _round_up(pl.cdiv(M, 8), align))       # >= ~8 grid steps
    rows = max(align, (rows // align) * align)
    rows = min(rows, (M // align) * align)
    return rows


# ------------------------------ Python wrapper ------------------------------ #

def layernorm(x, a_2, b_2, eps=EPS):
    """Pallas TPU LayerNorm over the last axis of x (any leading shape)."""
    orig_shape = x.shape
    D = orig_shape[-1]
    x2 = x.reshape(-1, D)
    M = x2.shape[0]
    itemsize = x2.dtype.itemsize
    vmem_limit = _vmem_limit_bytes()

    a_f = a_2.reshape(1, D).astype(jnp.float32)
    b_f = b_2.reshape(1, D).astype(jnp.float32)

    cparams = pltpu.CompilerParams(
        dimension_semantics=("parallel",),   # shard row tiles across TCs on v7x
        vmem_limit_bytes=vmem_limit,
    )

    # Lane-dense packing for narrow feature dims (D in {16, 32, 64}).
    k = 128 // D if (1 < D < 128 and 128 % D == 0) else 1
    if 1 < k <= 8 and M % k == 0:
        W = k * D
        Mr = M // k
        xp = x2.reshape(Mr, W)               # row-major: metadata-only reshape
        tm = _pick_block_rows(Mr, W, itemsize, vmem_limit)
        out = pl.pallas_call(
            functools.partial(_layernorm_packed_kernel, eps=eps, d=D, k=k),
            out_shape=jax.ShapeDtypeStruct((Mr, W), x.dtype),
            grid=(pl.cdiv(Mr, tm),),         # partial last block: OOB writes masked
            in_specs=[
                pl.BlockSpec((tm, W), lambda i: (i, 0)),   # x: streams tile-by-tile
                pl.BlockSpec((1, D), lambda i: (0, 0)),    # gamma: VMEM-resident
                pl.BlockSpec((1, D), lambda i: (0, 0)),    # beta:  VMEM-resident
            ],
            out_specs=pl.BlockSpec((tm, W), lambda i: (i, 0)),
            compiler_params=cparams,
        )(xp, a_f, b_f)
        return out.reshape(orig_shape)

    # TODO(synk): D < 128 with M % (128//D) != 0, or D not dividing 128, still
    # runs at partial lane utilization (masked stores); packing those shapes
    # would require row padding, which costs an extra HBM pass.
    tm = _pick_block_rows(M, D, itemsize, vmem_limit)
    out = pl.pallas_call(
        functools.partial(_layernorm_kernel, eps=eps),
        out_shape=jax.ShapeDtypeStruct((M, D), x.dtype),
        grid=(pl.cdiv(M, tm),),              # partial last block: OOB writes masked
        in_specs=[
            pl.BlockSpec((tm, D), lambda i: (i, 0)),
            pl.BlockSpec((1, D), lambda i: (0, 0)),
            pl.BlockSpec((1, D), lambda i: (0, 0)),
        ],
        out_specs=pl.BlockSpec((tm, D), lambda i: (i, 0)),
        compiler_params=cparams,
    )(x2, a_f, b_f)
    return out.reshape(orig_shape)


# ----------------------------- pure-JAX reference ---------------------------- #

def layernorm_ref(x, a_2, b_2, eps=EPS):
    xf = x.astype(jnp.float32)
    mean = jnp.mean(xf, axis=-1, keepdims=True)
    var = jnp.sum((xf - mean) ** 2, axis=-1, keepdims=True) / (xf.shape[-1] - 1)
    std = jnp.sqrt(var)
    return (a_2.astype(jnp.float32) * (xf - mean) / (std + eps)
            + b_2.astype(jnp.float32)).astype(x.dtype)


# ---------------------------------- main ------------------------------------ #

if __name__ == "__main__":
    key = jax.random.PRNGKey(0)
    k1, k2, k3, k4, k5 = jax.random.split(key, 5)

    # Case 1: module-sized shape (batch=2, seq=8, features=32) — exercises the
    # lane-dense packed path (k = 4 rows per 128-lane group).
    D = 32
    x = jax.random.normal(k1, (2, 8, D), jnp.float32)
    a_2 = 1.0 + 0.1 * jax.random.normal(k2, (D,), jnp.float32)
    b_2 = 0.1 * jax.random.normal(k3, (D,), jnp.float32)

    out = jax.block_until_ready(layernorm(x, a_2, b_2))
    ref = layernorm_ref(x, a_2, b_2)
    assert out.shape == x.shape
    assert bool(jnp.all(jnp.isfinite(out)))
    assert jnp.allclose(out, ref, rtol=1e-5, atol=1e-5), float(
        jnp.max(jnp.abs(out - ref)))

    # Case 2: D = 128 — simple path, multi-tile grid with a *partial* last
    # block (M = 1200 rows, tm = 152 -> 8 grid steps, masked tail writes).
    D2 = 128
    x_big = jax.random.normal(k4, (2, 600, D2), jnp.float32)
    g2 = jnp.ones((D2,), jnp.float32)
    b2 = jnp.zeros((D2,), jnp.float32)
    out2 = jax.block_until_ready(layernorm(x_big, g2, b2))
    ref2 = layernorm_ref(x_big, g2, b2)
    assert out2.shape == x_big.shape
    assert jnp.allclose(out2, ref2, rtol=1e-5, atol=1e-5), float(
        jnp.max(jnp.abs(out2 - ref2)))

    # Case 3: bf16 input — exercises dtype-aware sublane alignment (16) and
    # the f32 in-kernel math path.
    D3 = 256
    x_bf = jax.random.normal(k5, (4, 64, D3), jnp.float32).astype(jnp.bfloat16)
    g3 = jnp.ones((D3,), jnp.float32)
    b3 = jnp.zeros((D3,), jnp.float32)
    out3 = jax.block_until_ready(layernorm(x_bf, g3, b3))
    ref3 = layernorm_ref(x_bf, g3, b3)
    assert out3.shape == x_bf.shape
    assert jnp.allclose(out3.astype(jnp.float32), ref3.astype(jnp.float32),
                        rtol=5e-2, atol=5e-2)

    print("KERNEL_OK")
</pallas_src>

<mosaic_0001>
module attributes {stable_mosaic.version = 11 : i64} {
  func.func @_layernorm_packed_kernel(%arg0: i32, %arg1: memref<4x128xf32, #tpu.memory_space<vmem>>, %arg2: memref<1x32xf32, #tpu.memory_space<vmem>>, %arg3: memref<1x32xf32, #tpu.memory_space<vmem>>, %arg4: memref<4x128xf32, #tpu.memory_space<vmem>>) attributes {dimension_semantics = [#tpu.dimension_semantics<parallel>], iteration_bounds = array<i64: 1>, scalar_prefetch = 0 : i64, scratch_operands = 0 : i64, tpu.core_type = #tpu.core_type<tc>, window_params = [{transform_indices = @transform_0, window_bounds = array<i64: 4, 128>}, {pipeline_mode = #tpu.pipeline_mode<synchronous>, transform_indices = @transform_1, window_bounds = array<i64: 1, 32>}, {pipeline_mode = #tpu.pipeline_mode<synchronous>, transform_indices = @transform_2, window_bounds = array<i64: 1, 32>}, {transform_indices = @transform_3, window_bounds = array<i64: 4, 128>}]} {
    %c0 = arith.constant 0 : index
    %c0_0 = arith.constant 0 : index
    %0 = vector.load %arg1[%c0, %c0_0] : memref<4x128xf32, #tpu.memory_space<vmem>>, vector<4x128xf32>
    %c0_1 = arith.constant 0 : index
    %c0_2 = arith.constant 0 : index
    %1 = vector.load %arg2[%c0_1, %c0_2] : memref<1x32xf32, #tpu.memory_space<vmem>>, vector<1x32xf32>
    %c0_3 = arith.constant 0 : index
    %c0_4 = arith.constant 0 : index
    %2 = vector.load %arg3[%c0_3, %c0_4] : memref<1x32xf32, #tpu.memory_space<vmem>>, vector<1x32xf32>
    %3 = vector.extract_strided_slice %0 {offsets = [0, 0], sizes = [4, 32], strides = [1, 1]} : vector<4x128xf32> to vector<4x32xf32>
    %cst = arith.constant dense<0.000000e+00> : vector<4xf32>
    %4 = vector.multi_reduction <add>, %3, %cst [1] : vector<4x32xf32> to vector<4xf32>
    %5 = vector.shape_cast %4 : vector<4xf32> to vector<4x1xf32>
    %cst_5 = arith.constant 3.200000e+01 : f32
    %6 = vector.broadcast %cst_5 : f32 to vector<4x1xf32>
    %7 = arith.divf %5, %6 : vector<4x1xf32>
    %8 = vector.broadcast %7 : vector<4x1xf32> to vector<4x32xf32>
    %9 = arith.subf %3, %8 : vector<4x32xf32>
    %10 = arith.mulf %9, %9 : vector<4x32xf32>
    %cst_6 = arith.constant dense<0.000000e+00> : vector<4xf32>
    %11 = vector.multi_reduction <add>, %10, %cst_6 [1] : vector<4x32xf32> to vector<4xf32>
    %12 = vector.shape_cast %11 : vector<4xf32> to vector<4x1xf32>
    %cst_7 = arith.constant 0.0322580636 : f32
    %13 = vector.broadcast %cst_7 : f32 to vector<4x1xf32>
    %14 = arith.mulf %12, %13 : vector<4x1xf32>
    %15 = math.sqrt %14 : vector<4x1xf32>
    %cst_8 = arith.constant 9.99999997E-7 : f32
    %16 = vector.broadcast %cst_8 : f32 to vector<4x1xf32>
    %17 = arith.addf %15, %16 : vector<4x1xf32>
    %18 = tpu.reciprocal %17 : vector<4x1xf32> -> vector<4x1xf32>
    %19 = vector.broadcast %18 : vector<4x1xf32> to vector<4x32xf32>
    %20 = arith.mulf %9, %19 : vector<4x32xf32>
    %21 = vector.broadcast %1 : vector<1x32xf32> to vector<4x32xf32>
    %22 = arith.mulf %21, %20 : vector<4x32xf32>
    %23 = vector.broadcast %2 : vector<1x32xf32> to vector<4x32xf32>
    %24 = arith.addf %22, %23 : vector<4x32xf32>
    %25 = vector.extract_strided_slice %0 {offsets = [0, 32], sizes = [4, 32], strides = [1, 1]} : vector<4x128xf32> to vector<4x32xf32>
    %cst_9 = arith.constant dense<0.000000e+00> : vector<4xf32>
    %26 = vector.multi_reduction <add>, %25, %cst_9 [1] : vector<4x32xf32> to vector<4xf32>
    %27 = vector.shape_cast %26 : vector<4xf32> to vector<4x1xf32>
    %cst_10 = arith.constant 3.200000e+01 : f32
    %28 = vector.broadcast %cst_10 : f32 to vector<4x1xf32>
    %29 = arith.divf %27, %28 : vector<4x1xf32>
    %30 = vector.broadcast %29 : vector<4x1xf32> to vector<4x32xf32>
    %31 = arith.subf %25, %30 : vector<4x32xf32>
    %32 = arith.mulf %31, %31 : vector<4x32xf32>
    %cst_11 = arith.constant dense<0.000000e+00> : vector<4xf32>
    %33 = vector.multi_reduction <add>, %32, %cst_11 [1] : vector<4x32xf32> to vector<4xf32>
    %34 = vector.shape_cast %33 : vector<4xf32> to vector<4x1xf32>
    %cst_12 = arith.constant 0.0322580636 : f32
    %35 = vector.broadcast %cst_12 : f32 to vector<4x1xf32>
    %36 = arith.mulf %34, %35 : vector<4x1xf32>
    %37 = math.sqrt %36 : vector<4x1xf32>
    %cst_13 = arith.constant 9.99999997E-7 : f32
    %38 = vector.broadcast %cst_13 : f32 to vector<4x1xf32>
    %39 = arith.addf %37, %38 : vector<4x1xf32>
    %40 = tpu.reciprocal %39 : vector<4x1xf32> -> vector<4x1xf32>
    %41 = vector.broadcast %40 : vector<4x1xf32> to vector<4x32xf32>
    %42 = arith.mulf %31, %41 : vector<4x32xf32>
    %43 = vector.broadcast %1 : vector<1x32xf32> to vector<4x32xf32>
    %44 = arith.mulf %43, %42 : vector<4x32xf32>
    %45 = vector.broadcast %2 : vector<1x32xf32> to vector<4x32xf32>
    %46 = arith.addf %44, %45 : vector<4x32xf32>
    %47 = vector.extract_strided_slice %0 {offsets = [0, 64], sizes = [4, 32], strides = [1, 1]} : vector<4x128xf32> to vector<4x32xf32>
    %cst_14 = arith.constant dense<0.000000e+00> : vector<4xf32>
    %48 = vector.multi_reduction <add>, %47, %cst_14 [1] : vector<4x32xf32> to vector<4xf32>
    %49 = vector.shape_cast %48 : vector<4xf32> to vector<4x1xf32>
    %cst_15 = arith.constant 3.200000e+01 : f32
    %50 = vector.broadcast %cst_15 : f32 to vector<4x1xf32>
    %51 = arith.divf %49, %50 : vector<4x1xf32>
    %52 = vector.broadcast %51 : vector<4x1xf32> to vector<4x32xf32>
    %53 = arith.subf %47, %52 : vector<4x32xf32>
    %54 = arith.mulf %53, %53 : vector<4x32xf32>
    %cst_16 = arith.constant dense<0.000000e+00> : vector<4xf32>
    %55 = vector.multi_reduction <add>, %54, %cst_16 [1] : vector<4x32xf32> to vector<4xf32>
    %56 = vector.shape_cast %55 : vector<4xf32> to vector<4x1xf32>
    %cst_17 = arith.constant 0.0322580636 : f32
    %57 = vector.broadcast %cst_17 : f32 to vector<4x1xf32>
    %58 = arith.mulf %56, %57 : vector<4x1xf32>
    %59 = math.sqrt %58 : vector<4x1xf32>
    %cst_18 = arith.constant 9.99999997E-7 : f32
    %60 = vector.broadcast %cst_18 : f32 to vector<4x1xf32>
    %61 = arith.addf %59, %60 : vector<4x1xf32>
    %62 = tpu.reciprocal %61 : vector<4x1xf32> -> vector<4x1xf32>
    %63 = vector.broadcast %62 : vector<4x1xf32> to vector<4x32xf32>
    %64 = arith.mulf %53, %63 : vector<4x32xf32>
    %65 = vector.broadcast %1 : vector<1x32xf32> to vector<4x32xf32>
    %66 = arith.mulf %65, %64 : vector<4x32xf32>
    %67 = vector.broadcast %2 : vector<1x32xf32> to vector<4x32xf32>
    %68 = arith.addf %66, %67 : vector<4x32xf32>
    %69 = vector.extract_strided_slice %0 {offsets = [0, 96], sizes = [4, 32], strides = [1, 1]} : vector<4x128xf32> to vector<4x32xf32>
    %cst_19 = arith.constant dense<0.000000e+00> : vector<4xf32>
    %70 = vector.multi_reduction <add>, %69, %cst_19 [1] : vector<4x32xf32> to vector<4xf32>
    %71 = vector.shape_cast %70 : vector<4xf32> to vector<4x1xf32>
    %cst_20 = arith.constant 3.200000e+01 : f32
    %72 = vector.broadcast %cst_20 : f32 to vector<4x1xf32>
    %73 = arith.divf %71, %72 : vector<4x1xf32>
    %74 = vector.broadcast %73 : vector<4x1xf32> to vector<4x32xf32>
    %75 = arith.subf %69, %74 : vector<4x32xf32>
    %76 = arith.mulf %75, %75 : vector<4x32xf32>
    %cst_21 = arith.constant dense<0.000000e+00> : vector<4xf32>
    %77 = vector.multi_reduction <add>, %76, %cst_21 [1] : vector<4x32xf32> to vector<4xf32>
    %78 = vector.shape_cast %77 : vector<4xf32> to vector<4x1xf32>
    %cst_22 = arith.constant 0.0322580636 : f32
    %79 = vector.broadcast %cst_22 : f32 to vector<4x1xf32>
    %80 = arith.mulf %78, %79 : vector<4x1xf32>
    %81 = math.sqrt %80 : vector<4x1xf32>
    %cst_23 = arith.constant 9.99999997E-7 : f32
    %82 = vector.broadcast %cst_23 : f32 to vector<4x1xf32>
    %83 = arith.addf %81, %82 : vector<4x1xf32>
    %84 = tpu.reciprocal %83 : vector<4x1xf32> -> vector<4x1xf32>
    %85 = vector.broadcast %84 : vector<4x1xf32> to vector<4x32xf32>
    %86 = arith.mulf %75, %85 : vector<4x32xf32>
    %87 = vector.broadcast %1 : vector<1x32xf32> to vector<4x32xf32>
    %88 = arith.mulf %87, %86 : vector<4x32xf32>
    %89 = vector.broadcast %2 : vector<1x32xf32> to vector<4x32xf32>
    %90 = arith.addf %88, %89 : vector<4x32xf32>
    %91 = tpu.concatenate %24, %46, %68, %90 in 1 : vector<4x32xf32>, vector<4x32xf32>, vector<4x32xf32>, vector<4x32xf32> -> vector<4x128xf32>
    %c0_24 = arith.constant 0 : index
    %c0_25 = arith.constant 0 : index
    %92 = vector.load %arg4[%c0_24, %c0_25] : memref<4x128xf32, #tpu.memory_space<vmem>>, vector<4x128xf32>
    tpu.vector_store %arg4[%c0_24, %c0_25], %91 {strides = array<i32>} : memref<4x128xf32, #tpu.memory_space<vmem>>, vector<4x128xf32>,
    return
  }
  func.func @transform_0(%arg0: i32) -> (i32, i32) {
    %c0_i32 = arith.constant 0 : i32
    %c0_i32_0 = arith.constant 0 : i32
    return %arg0, %c0_i32 : i32, i32
  }
  func.func @transform_1(%arg0: i32) -> (i32, i32) {
    %c0_i32 = arith.constant 0 : i32
    %c0_i32_0 = arith.constant 0 : i32
    %c0_i32_1 = arith.constant 0 : i32
    return %c0_i32, %c0_i32_0 : i32, i32
  }
  func.func @transform_2(%arg0: i32) -> (i32, i32) {
    %c0_i32 = arith.constant 0 : i32
    %c0_i32_0 = arith.constant 0 : i32
    %c0_i32_1 = arith.constant 0 : i32
    return %c0_i32, %c0_i32_0 : i32, i32
  }
  func.func @transform_3(%arg0: i32) -> (i32, i32) {
    %c0_i32 = arith.constant 0 : i32
    %c0_i32_0 = arith.constant 0 : i32
    return %arg0, %c0_i32 : i32, i32
  }
}

</mosaic_0001>

<bundles_post_ra>
// kernel: tpu_custom_call.1
= control target key start
LH: loop header
LB: loop body
LE: loop exit
PB: predicated region body
PF: predicated region fallthrough
CT: control target
= control target key end

     0   :  { %8 = vsyncpa [#allocation3], 0  ;;  %s491_s0 = inlined_call_operand.hbm [shape: f32[4,128], index: 0, kind: input, shape index: {}]   ;;  %s492_s1 = inlined_call_operand.hbm [shape: f32[1,32], index: 1, kind: input, shape index: {}]   ;;  %s493_s2 = inlined_call_operand.vmem [shape: f32[1,32], index: 2, kind: input, shape index: {}]   ;;  %s494_s3 = inlined_call_operand.hbm [shape: f32[4,128], index: 3, kind: output, shape index: {}]  }
   0x1   :  { %9 = vsyncpa [#allocation6], 0 }
   0x2   :  { %10 = vsyncpa [#allocation4], 0  ;;  %s16_s14 = sshll.u32 %s491_s0, 4  ;;  %s396_s15 = smov [#allocation2]   ;;  %s17_s14 = int_to_ptr.hbm [resolvable:$true] %s16_s14 }
   0x3   :  { %s18_s16 = sshll.u32 %s396_s15, 4  ;;  %s27_s19 = sshll.u32 %s492_s1, 4  ;;  %s19_s16 = int_to_ptr.vmem [resolvable:$true] %s18_s16  ;;  %s28_s19 = int_to_ptr.hbm [resolvable:$true] %s27_s19 }
   0x4   :  { %21 = dma.hbm_to_vmem [thread:$0]  %s17_s14, 64, %s19_s16, [#allocation3]  }
   0x5   :  { %s397_s20 = smov [#allocation5]  }
   0x6   :  { %s29_s21 = sshll.u32 %s397_s20, 4  ;;  %s30_s21 = int_to_ptr.vmem [resolvable:$true] %s29_s21 }
   0x7   :  { %32 = dma.hbm_to_vmem [thread:$0]  %s28_s19, 16, %s30_s21, [#allocation6]  }
   0x8   :  { %390 = dma.done.wait [#allocation3], 64  }
   0x9   :  { %391 = vsyncadd [#allocation3], 4294967232 }
   0xa   :  { %392 = dma.done.wait [#allocation6], 16  }
   0xb   :  { %393 = vsyncadd [#allocation6], 4294967280  ;;  %v429_v0 = vld [vmem:[#allocation2] sm:$0xf]  ;;  %s398_s0 = smov 96   ;;  %s399_s22 = smov 32  }
   0xc   :  { %101 = vrot.lane.b32.xlu0 %v429_v0, %s398_s0  ;;  %203 = vrot.lane.b32.xlu1 %v429_v0, %s399_s22  ;;  %s400_s1 = smov 64   ;;  %vm46_vm0 = vcmask 257024   ;;  %v401_v7 = vmov 32.0   ;;  %s280_s28 = sshll.u32 %s494_s3, 4  ;;  %s281_s28 = int_to_ptr.hbm [resolvable:$true] %s280_s28 }
   0xd   :  { %300 = vrcp.f32 %v401_v7  ;;  %v47_v32 = vsel %vm46_vm0, %v429_v0, 0.0 }
  0x13   :  { %v301_v8 = vpop.eup %300 }
  0x14   :  { %152 = vrot.lane.b32.xlu0 %v429_v0, %s400_s1  ;;  %v51_v9 = vmul.f32 32.0, %v301_v8  ;;  %vm55_vm1 = vweird.f32 %v301_v8 }
  0x16   :  { %v52_v10 = vsub.f32 1.0, %v51_v9 }
  0x18   :  { %v53_v11 = vmul.f32 %v301_v8, %v52_v10 }
  0x1a   :  { %v54_v12 = vadd.f32 %v301_v8, %v53_v11 }
  0x1c   :  { %v440_v13 = vsel %vm55_vm1, %v301_v8, %v54_v12 }
  0x7e   :  { %v102_v1 = vpop.permute.xlu0 %101  ;;  %v204_v5 = vpop.permute.xlu1 %203 }
  0x7f   :  { %v104_v2 = vsel %vm46_vm0, %v102_v1, 0.0  ;;  %v206_v6 = vsel %vm46_vm0, %v204_v5, 0.0 }
  0x80   :  { %105 = vadd.xlane.f32.xlu1 %v104_v2 }
  0x86   :  { %v153_v3 = vpop.permute.xlu0 %152 }
  0x87   :  { %v155_v4 = vsel %vm46_vm0, %v153_v3, 0.0 }
  0x88   :  { %156 = vadd.xlane.f32.xlu2 %v155_v4 }
  0x90   :  { %207 = vadd.xlane.f32.xlu2 %v206_v6 }
  0xf3   :  { %v106_v14 = vpop.xlane.xlu1 %105 }
  0xf4   :  { %v107_v15 = vmul.f32 %v106_v14, %v440_v13 }
  0xf6   :  { %v444_v16 = vsub.f32 %v429_v0, %v107_v15 }
  0xf8   :  { %v109_v17 = vmul.f32 %v444_v16, %v444_v16 }
  0xfa   :  { %111 = vrot.lane.b32.xlu0 %v109_v17, %s398_s0 }
  0xfb   :  { %v157_v18 = vpop.xlane.xlu2 %156 }
  0xfc   :  { %v158_v19 = vmul.f32 %v157_v18, %v440_v13 }
  0xfe   :  { %v451_v20 = vsub.f32 %v429_v0, %v158_v19 }
 0x100   :  { %v160_v21 = vmul.f32 %v451_v20, %v451_v20 }
 0x102   :  { %162 = vrot.lane.b32.xlu2 %v160_v21, %s400_s1 }
 0x103   :  { %v208_v22 = vpop.xlane.xlu2 %207 }
 0x104   :  { %v209_v23 = vmul.f32 %v208_v22, %v440_v13 }
 0x106   :  { %v458_v24 = vsub.f32 %v429_v0, %v209_v23 }
 0x108   :  { %v211_v25 = vmul.f32 %v458_v24, %v458_v24 }
 0x10a   :  { %213 = vrot.lane.b32.xlu0 %v211_v25, %s399_s22 }
 0x15c   :  { %v163_v26 = vpop.permute.xlu2 %162 }
 0x15d   :  { %v165_v27 = vsel %vm46_vm0, %v163_v26, 0.0 }
 0x15e   :  { %166 = vadd.xlane.f32.xlu2 %v165_v27 }
 0x16c   :  { %v112_v28 = vpop.permute.xlu0 %111 }
 0x16d   :  { %v114_v29 = vsel %vm46_vm0, %v112_v28, 0.0 }
 0x16e   :  { %115 = vadd.xlane.f32.xlu0 %v114_v29 }
 0x17c   :  { %v214_v30 = vpop.permute.xlu0 %213 }
 0x17d   :  { %v216_v31 = vsel %vm46_vm0, %v214_v30, 0.0 }
 0x17e   :  { %217 = vadd.xlane.f32.xlu1 %v216_v31 }
 0x186   :  { %48 = vadd.xlane.f32.xlu1 %v47_v32 }
 0x1d1   :  { %v167_v33 = vpop.xlane.xlu2 %166 }
 0x1d2   :  { %v168_v34 = vmul.f32 0.032258064, %v167_v33 }
 0x1d4   :  { %302 = vrsqrt.f32 %v168_v34  ;;  %vm176_vm2 = vcmp.eq.f32.partialorder %v168_v34, inf  ;;  %v179_v49 = vand.u32 2147483648, %v168_v34  ;;  %vm178_vm3 = vcmp.eq.f32.partialorder %v168_v34, 0.0 }
 0x1da   :  { %v303_v35 = vpop.eup %302 }
 0x1db   :  { %v170_v36 = vmul.f32 %v303_v35, %v168_v34 }
 0x1dd   :  { %v171_v37 = vmul.f32 %v303_v35, %v170_v36 }
 0x1df   :  { %v172_v38 = vmul.f32 0.5, %v171_v37 }
 0x1e1   :  { %v116_v39 = vpop.xlane.xlu0 %115  ;;  %v173_v40 = vsub.f32 1.5, %v172_v38 }
 0x1e2   :  { %v117_v41 = vmul.f32 0.032258064, %v116_v39 }
 0x1e3   :  { %v174_v42 = vmul.f32 %v303_v35, %v173_v40 }
 0x1e4   :  { %304 = vrsqrt.f32 %v117_v41  ;;  %vm125_vm4 = vcmp.eq.f32.partialorder %v117_v41, inf  ;;  %v128_v57 = vand.u32 2147483648, %v117_v41  ;;  %vm127_vm5 = vcmp.eq.f32.partialorder %v117_v41, 0.0 }
 0x1e5   :  { %v175_v44 = vmul.f32 %v174_v42, %v168_v34 }
 0x1e7   :  { %v177_v47 = vsel %vm176_vm2, %v168_v34, %v175_v44 }
 0x1e8   :  { %v180_v52 = vsel %vm178_vm3, %v179_v49, %v177_v47 }
 0x1e9   :  { %v181_v55 = vadd.f32 1e-06, %v180_v52  ;;  %v298_v52 = vld [vmem:[#allocation5] ss:$0 sm:$0xff] }
 0x1ea   :  { %v305_v43 = vpop.eup %304 }
 0x1eb   :  { %v119_v45 = vmul.f32 %v305_v43, %v117_v41  ;;  %v193_v32 = vand.u32 2147483648, %v181_v55  ;;  %vm187_vm13 = vweird.f32 %v181_v55  ;;  %v191_v33 = vand.u32 2147483647, %v181_v55 }
 0x1ed   :  { %v120_v46 = vmul.f32 %v305_v43, %v119_v45  ;;  %v194_v37 = vor.u32 1.1754944e-38, %v193_v32  ;;  %vm192_vm15 = vcmp.eq.f32.partialorder %v191_v33, 8.507059e+37 }
 0x1ef   :  { %v121_v48 = vmul.f32 0.5, %v120_v46 }
 0x1f1   :  { %v122_v50 = vsub.f32 1.5, %v121_v48  ;;  %v218_v51 = vpop.xlane.xlu1 %217 }
 0x1f2   :  { %v219_v53 = vmul.f32 0.032258064, %v218_v51 }
 0x1f3   :  { %v123_v54 = vmul.f32 %v305_v43, %v122_v50 }
 0x1f4   :  { %306 = vrsqrt.f32 %v219_v53  ;;  %vm227_vm6 = vcmp.eq.f32.partialorder %v219_v53, inf  ;;  %v230_v19 = vand.u32 2147483648, %v219_v53  ;;  %vm229_vm8 = vcmp.eq.f32.partialorder %v219_v53, 0.0 }
 0x1f5   :  { %v124_v56 = vmul.f32 %v123_v54, %v117_v41  ;;  %308 = vrcp.f32 %v181_v55  ;;  %v299_v54 = vld [vmem:[%s493_s2] ss:$0 sm:$0xff]  ;;  %s402_s2 = smov [#allocation7]  }
 0x1f6   :  { %s278_s25 = sshll.u32 %s402_s2, 4  ;;  %s279_s25 = int_to_ptr.vmem [resolvable:$true] %s278_s25 }
 0x1f7   :  { %v126_v58 = vsel %vm125_vm4, %v117_v41, %v124_v56 }
 0x1f8   :  { %v129_v59 = vsel %vm127_vm5, %v128_v57, %v126_v58 }
 0x1f9   :  { %v49_v60 = vpop.xlane.xlu1 %48  ;;  %v130_v61 = vadd.f32 1e-06, %v129_v59 }
 0x1fa   :  { %v307_v62 = vpop.eup %306  ;;  %v57_v63 = vmul.f32 %v440_v13, %v49_v60 }
 0x1fb   :  { %v221_v1 = vmul.f32 %v307_v62, %v219_v53  ;;  %310 = vrcp.f32 %v130_v61  ;;  %v309_v4 = vpop.eup %308  ;;  %v142_v15 = vand.u32 2147483648, %v130_v61  ;;  %v140_v18 = vand.u32 2147483647, %v130_v61 }
 0x1fc   :  { %v470_v2 = vsub.f32 %v429_v0, %v57_v63  ;;  %v183_v10 = vmul.f32 %v309_v4, %v181_v55  ;;  %vm136_vm9 = vweird.f32 %v130_v61  ;;  %vm188_vm12 = vweird.f32 %v309_v4 }
 0x1fd   :  { %v222_v3 = vmul.f32 %v307_v62, %v221_v1  ;;  %v143_v25 = vor.u32 1.1754944e-38, %v142_v15  ;;  %vm141_vm11 = vcmp.eq.f32.partialorder %v140_v18, 8.507059e+37  ;;  %vm189_vm14 = vmor %vm187_vm13, %vm188_vm12  ;;  %vm270_vm12 = vcmask 785408  }
 0x1fe   :  { %v59_v5 = vmul.f32 %v470_v2, %v470_v2  ;;  %v184_v17 = vsub.f32 1.0, %v183_v10 }
 0x1ff   :  { %v223_v6 = vmul.f32 0.5, %v222_v3 }
 0x200   :  { %v60_v7 = vsel %vm46_vm0, %v59_v5, 0.0  ;;  %v185_v28 = vmul.f32 %v309_v4, %v184_v17 }
 0x201   :  { %v311_v8 = vpop.eup %310  ;;  %v224_v9 = vsub.f32 1.5, %v223_v6  ;;  %61 = vadd.xlane.f32.xlu1 %v60_v7 }
 0x202   :  { %v132_v11 = vmul.f32 %v311_v8, %v130_v61  ;;  %vm137_vm7 = vweird.f32 %v311_v8  ;;  %v186_v31 = vadd.f32 %v309_v4, %v185_v28 }
 0x203   :  { %v225_v12 = vmul.f32 %v307_v62, %v224_v9  ;;  %vm138_vm10 = vmor %vm136_vm9, %vm137_vm7 }
 0x204   :  { %v133_v13 = vsub.f32 1.0, %v132_v11  ;;  %v190_v35 = vsel %vm189_vm14, %v309_v4, %v186_v31 }
 0x205   :  { %v226_v14 = vmul.f32 %v225_v12, %v219_v53  ;;  %v195_v39 = vsel %vm192_vm15, %v194_v37, %v190_v35 }
 0x206   :  { %v134_v0 = vmul.f32 %v311_v8, %v133_v13 }
 0x207   :  { %v228_v21 = vsel %vm227_vm6, %v219_v53, %v226_v14 }
 0x208   :  { %v135_v22 = vadd.f32 %v311_v8, %v134_v0  ;;  %v231_v23 = vsel %vm229_vm8, %v230_v19, %v228_v21 }
 0x209   :  { %v232_v26 = vadd.f32 1e-06, %v231_v23 }
 0x20a   :  { %v139_v27 = vsel %vm138_vm10, %v311_v8, %v135_v22  ;;  %vm266_vm10 = vcmask 261120  }
 0x20b   :  { %v144_v29 = vsel %vm141_vm11, %v143_v25, %v139_v27  ;;  %312 = vrcp.f32 %v232_v26  ;;  %v244_v40 = vand.u32 2147483648, %v232_v26  ;;  %v242_v42 = vand.u32 2147483647, %v232_v26 }
 0x20c   :  { %v145_v30 = vmul.f32 %v144_v29, %v444_v16  ;;  %v196_v16 = vmul.f32 %v195_v39, %v451_v20  ;;  %vm238_vm1 = vweird.f32 %v232_v26  ;;  %vm268_vm11 = vcmask 523264  }
 0x20d   :  { %v245_v44 = vor.u32 1.1754944e-38, %v244_v40  ;;  %vm243_vm3 = vcmp.eq.f32.partialorder %v242_v42, 8.507059e+37 }
 0x20e   :  { %147 = vrot.lane.b32.xlu0 %v145_v30, %s398_s0 }
 0x211   :  { %v313_v34 = vpop.eup %312 }
 0x212   :  { %v234_v36 = vmul.f32 %v313_v34, %v232_v26  ;;  %vm239_vm0 = vweird.f32 %v313_v34 }
 0x213   :  { %vm240_vm2 = vmor %vm238_vm1, %vm239_vm0 }
 0x214   :  { %v235_v38 = vsub.f32 1.0, %v234_v36 }
 0x216   :  { %v236_v41 = vmul.f32 %v313_v34, %v235_v38 }
 0x218   :  { %v237_v43 = vadd.f32 %v313_v34, %v236_v41 }
 0x21a   :  { %198 = vrot.lane.b32.xlu1 %v196_v16, %s400_s1  ;;  %v241_v45 = vsel %vm240_vm2, %v313_v34, %v237_v43 }
 0x21b   :  { %v246_v46 = vsel %vm243_vm3, %v245_v44, %v241_v45 }
 0x21c   :  { %v247_v47 = vmul.f32 %v246_v46, %v458_v24 }
 0x21e   :  { %249 = vrot.lane.b32.xlu2 %v247_v47, %s399_s22 }
 0x274   :  { %v62_v48 = vpop.xlane.xlu1 %61 }
 0x275   :  { %v63_v49 = vmul.f32 0.032258064, %v62_v48 }
 0x277   :  { %314 = vrsqrt.f32 %v63_v49  ;;  %vm71_vm4 = vcmp.eq.f32.partialorder %v63_v49, inf  ;;  %v74_v62 = vand.u32 2147483648, %v63_v49  ;;  %vm73_vm5 = vcmp.eq.f32.partialorder %v63_v49, 0.0 }
 0x278   :  { %v250_v59 = vpop.permute.xlu2 %249 }
 0x279   :  { %v252_v60 = vmul.f32 %v298_v52, %v250_v59 }
 0x27b   :  { %v253_v1 = vadd.f32 %v299_v54, %v252_v60 }
 0x27d   :  { %v315_v50 = vpop.eup %314 }
 0x27e   :  { %v65_v51 = vmul.f32 %v315_v50, %v63_v49 }
 0x280   :  { %v66_v20 = vmul.f32 %v315_v50, %v65_v51  ;;  %v148_v53 = vpop.permute.xlu0 %147 }
 0x281   :  { %v150_v55 = vmul.f32 %v298_v52, %v148_v53 }
 0x282   :  { %v67_v56 = vmul.f32 0.5, %v66_v20 }
 0x283   :  { %v151_v57 = vadd.f32 %v299_v54, %v150_v55 }
 0x284   :  { %v68_v58 = vsub.f32 1.5, %v67_v56 }
 0x285   :  { %255 = vrot.lane.b32.xlu0 %v151_v57, %s399_s22 }
 0x286   :  { %v69_v24 = vmul.f32 %v315_v50, %v68_v58 }
 0x288   :  { %v70_v61 = vmul.f32 %v69_v24, %v63_v49 }
 0x28a   :  { %v72_v63 = vsel %vm71_vm4, %v63_v49, %v70_v61 }
 0x28b   :  { %v75_v3 = vsel %vm73_vm5, %v74_v62, %v72_v63 }
 0x28c   :  { %v199_v4 = vpop.permute.xlu1 %198  ;;  %v76_v5 = vadd.f32 1e-06, %v75_v3 }
 0x28d   :  { %v201_v6 = vmul.f32 %v298_v52, %v199_v4  ;;  %263 = vrot.lane.b32.xlu0 %v253_v1, %s398_s0 }
 0x28e   :  { %316 = vrcp.f32 %v76_v5  ;;  %v88_v11 = vand.u32 2147483648, %v76_v5  ;;  %v86_v13 = vand.u32 2147483647, %v76_v5  ;;  %vm82_vm7 = vweird.f32 %v76_v5 }
 0x28f   :  { %v202_v7 = vadd.f32 %v299_v54, %v201_v6 }
 0x290   :  { %v89_v15 = vor.u32 1.1754944e-38, %v88_v11  ;;  %vm87_vm9 = vcmp.eq.f32.partialorder %v86_v13, 8.507059e+37 }
 0x291   :  { %259 = vrot.lane.b32.xlu1 %v202_v7, %s400_s1 }
 0x294   :  { %v317_v8 = vpop.eup %316 }
 0x295   :  { %v78_v9 = vmul.f32 %v317_v8, %v76_v5  ;;  %vm83_vm6 = vweird.f32 %v317_v8 }
 0x296   :  { %vm84_vm8 = vmor %vm82_vm7, %vm83_vm6 }
 0x297   :  { %v79_v10 = vsub.f32 1.0, %v78_v9 }
 0x299   :  { %v80_v12 = vmul.f32 %v317_v8, %v79_v10 }
 0x29b   :  { %v81_v14 = vadd.f32 %v317_v8, %v80_v12 }
 0x29d   :  { %v85_v17 = vsel %vm84_vm8, %v317_v8, %v81_v14 }
 0x29e   :  { %v90_v0 = vsel %vm87_vm9, %v89_v15, %v85_v17 }
 0x29f   :  { %v91_v18 = vmul.f32 %v90_v0, %v470_v2 }
 0x2a1   :  { %v95_v19 = vmul.f32 %v298_v52, %v91_v18 }
 0x2a3   :  { %v99_v21 = vadd.f32 %v299_v54, %v95_v19 }
 0x2f7   :  { %v256_v22 = vpop.permute.xlu0 %255 }
 0x2f8   :  { %v267_v23 = vsel %vm266_vm10, %v99_v21, %v256_v22 }
 0x2ff   :  { %v264_v26 = vpop.permute.xlu0 %263 }
 0x303   :  { %v260_v25 = vpop.permute.xlu1 %259 }
 0x304   :  { %v269_v27 = vsel %vm268_vm11, %v267_v23, %v260_v25 }
 0x305   :  { %v271_v28 = vsel %vm270_vm12, %v269_v27, %v264_v26 }
 0x306   :  { %272 = vst [vmem:[#allocation7] sm:$0xf] %v271_v28 }
 0x307   :  { %283 = dma.vmem_to_hbm [thread:$0]  %s279_s25, 64, %s281_s28, [#allocation4]  }
 0x308   :  { %394 = dma.done.wait [#allocation4], 64  }
 0x309   :  { %395 = vsyncadd [#allocation4], 4294967232 }
 0x30a   :  { %288 = vsyncpa [#allocation3], 1 }
 0x30b   :  { %289 = vsyncpa [#allocation6], 1 }
 0x30c   :  { %290 = vsyncpa [#allocation4], 1 }

</bundles_post_ra>
